<compile_context>
chip_gen: v5e
topology: v5e:2x2
jax: 0.10.0
libtpu: 0.0.40
codegen_flags: <defaults>
</compile_context>

<pallas_src>
import functools
import math

import numpy as np

import jax
import jax.numpy as jnp
from jax import lax
from jax.experimental import pallas as pl
from jax.experimental.pallas import tpu as pltpu


def _mha_kernel(*refs, num_heads, d_k, causal, has_mask):
    """One batch element per grid step; all heads processed in-body.

    Refs (in order):
      q, k, v   : (S, D)          bf16 activations of this batch element
      [mask]    : (S, S)          int8, nonzero = attend   (only if has_mask)
      wqkv      : (3, D, D)       bf16  [Wq^T / sqrt(d_k), Wk^T, Wv^T]
      bqkv      : (3, 1, D)       f32   [bq / sqrt(d_k),  bk,  bv]
      wo        : (H, d_k, D)     bf16  per-head rows of Wo^T
      bo        : (1, D)          f32
      out       : (S, D)
    """
    if has_mask:
        (q_ref, k_ref, v_ref, mask_ref,
         wqkv_ref, bqkv_ref, wo_ref, bo_ref, out_ref) = refs
    else:
        (q_ref, k_ref, v_ref,
         wqkv_ref, bqkv_ref, wo_ref, bo_ref, out_ref) = refs
        mask_ref = None

    f32, bf16 = jnp.float32, jnp.bfloat16

    q = q_ref[...]
    k = k_ref[...]
    v = v_ref[...]
    S = q.shape[0]

    # Full-width projections: lane-dense N = D, bf16 MXU operands, f32 acc.
    qp = (jnp.dot(q, wqkv_ref[0], preferred_element_type=f32)
          + bqkv_ref[0]).astype(bf16)
    kp = (jnp.dot(k, wqkv_ref[1], preferred_element_type=f32)
          + bqkv_ref[1]).astype(bf16)
    vp = (jnp.dot(v, wqkv_ref[2], preferred_element_type=f32)
          + bqkv_ref[2]).astype(bf16)

    if causal:
        rows = lax.broadcasted_iota(jnp.int32, (S, S), 0)
        cols = lax.broadcasted_iota(jnp.int32, (S, S), 1)
        keep = rows >= cols                     # built in-kernel: no mask DMA
    elif has_mask:
        keep = mask_ref[...] != 0
    else:
        keep = None

    # Statically-unrolled head loop: static lane slices of the projected
    # activations, per-head attention, per-head partial of the output
    # projection accumulated into a lane-dense (S, D) f32 value.
    acc = None
    for h in range(num_heads):
        sl = slice(h * d_k, (h + 1) * d_k)
        qh, kh, vh = qp[:, sl], kp[:, sl], vp[:, sl]

        # scores = (q Wq / sqrt(d_k)) @ (k Wk)^T  -- scale folded into Wq/bq.
        s = lax.dot_general(qh, kh, (((1,), (1,)), ((), ())),
                            preferred_element_type=f32)          # (S, S) f32
        if keep is not None:
            s = jnp.where(keep, s, jnp.float32(-1e9))

        # Softmax (f32) with deferred normalization: divide the small (S, d_k)
        # context instead of the (S, S) probability matrix (exact divide).
        m = jnp.max(s, axis=-1, keepdims=True)
        p = jnp.exp(s - m)
        l = jnp.sum(p, axis=-1, keepdims=True)
        ctx = jnp.dot(p.astype(bf16), vh, preferred_element_type=f32) / l

        part = jnp.dot(ctx.astype(bf16), wo_ref[h],
                       preferred_element_type=f32)                # (S, D)
        acc = part if acc is None else acc + part

    out_ref[...] = (acc + bo_ref[...]).astype(out_ref.dtype)


def prepare_params(params, *, num_heads):
    """One-time weight preprocessing, hoisted out of the per-call hot path."""
    D = params["wq"].shape[0]
    assert D % num_heads == 0
    d_k = D // num_heads
    scale = 1.0 / math.sqrt(d_k)
    bf16, f32 = jnp.bfloat16, jnp.float32

    # PyTorch nn.Linear stores W as (out, in); y = x @ W^T + b.
    wqkv = jnp.stack([params["wq"].T * scale,
                      params["wk"].T,
                      params["wv"].T], axis=0).astype(bf16)            # (3,D,D)
    bqkv = jnp.stack([params["bq"] * scale,
                      params["bk"],
                      params["bv"]], axis=0).reshape(3, 1, D).astype(f32)
    wo = params["wo"].T.reshape(num_heads, d_k, D).astype(bf16)        # (H,dk,D)
    bo = params["bo"].reshape(1, D).astype(f32)
    return {"wqkv": wqkv, "bqkv": bqkv, "wo": wo, "bo": bo}


def _round_up(x, m):
    return (x + m - 1) // m * m


def _tile_bytes(shape, itemsize):
    s = list(shape)
    if len(s) >= 1:
        s[-1] = _round_up(s[-1], 128)
    if len(s) >= 2:
        s[-2] = _round_up(s[-2], 8)
    n = 1
    for d in s:
        n *= d
    return n * itemsize


def _vmem_limit_bytes(S, D, H, has_mask, out_itemsize):
    d_k = D // H
    est = 0
    est += 2 * 3 * _tile_bytes((S, D), 2)               # q/k/v blocks (dbl-buf)
    est += 2 * _tile_bytes((S, D), out_itemsize)        # output block
    if has_mask:
        est += 2 * _tile_bytes((S, S), 1)
    est += 2 * (_tile_bytes((3, D, D), 2) + _tile_bytes((3, 1, D), 4)
                + _tile_bytes((H, d_k, D), 2) + _tile_bytes((1, D), 4))
    est += 3 * (_tile_bytes((S, D), 4) + _tile_bytes((S, D), 2))   # Q/K/V proj
    est += 2 * _tile_bytes((S, S), 4)                   # scores + probs
    est += 2 * _tile_bytes((S, D), 4)                   # ctx partial + acc
    return int(min(max(2 * est, 16 * 1024 * 1024), 100 * 1024 * 1024))


def multi_headed_attention(q, k, v, prepared, *, num_heads, mask=None,
                           causal=False, out_dtype=None):
    """q, k, v: (B, S, D); mask: optional (B, S, S), nonzero = attend."""
    B, S, D = q.shape
    assert D % num_heads == 0
    d_k = D // num_heads
    assert not (causal and mask is not None), "pass either causal=True or mask"
    has_mask = mask is not None
    out_dtype = q.dtype if out_dtype is None else out_dtype

    bf16 = jnp.bfloat16
    q_b, k_b, v_b = q.astype(bf16), k.astype(bf16), v.astype(bf16)

    kernel = functools.partial(_mha_kernel, num_heads=num_heads, d_k=d_k,
                               causal=causal, has_mask=has_mask)

    act_spec = pl.BlockSpec((None, S, D), lambda b: (b, 0, 0))
    in_specs = [act_spec, act_spec, act_spec]
    inputs = [q_b, k_b, v_b]
    if has_mask:
        in_specs.append(pl.BlockSpec((None, S, S), lambda b: (b, 0, 0)))
        inputs.append((mask != 0).astype(jnp.int8))
    in_specs += [
        pl.BlockSpec((3, D, D), lambda b: (0, 0, 0)),
        pl.BlockSpec((3, 1, D), lambda b: (0, 0, 0)),
        pl.BlockSpec((num_heads, d_k, D), lambda b: (0, 0, 0)),
        pl.BlockSpec((1, D), lambda b: (0, 0)),
    ]
    inputs += [prepared["wqkv"], prepared["bqkv"], prepared["wo"], prepared["bo"]]

    return pl.pallas_call(
        kernel,
        out_shape=jax.ShapeDtypeStruct((B, S, D), out_dtype),
        grid_spec=pltpu.PrefetchScalarGridSpec(
            num_scalar_prefetch=0,
            grid=(B,),
            in_specs=in_specs,
            out_specs=pl.BlockSpec((None, S, D), lambda b: (b, 0, 0)),
        ),
        compiler_params=pltpu.CompilerParams(
            dimension_semantics=("parallel",),
            vmem_limit_bytes=_vmem_limit_bytes(
                S, D, num_heads, has_mask, np.dtype(out_dtype).itemsize)),
    )(*inputs)


def _reference_mha(q, k, v, mask, params, *, num_heads):
    """Pure-JAX f32 reference mirroring the PyTorch module (dropout off)."""
    B, S, D = q.shape
    d_k = D // num_heads

    def lin(x, w, b):
        return x @ w.T + b

    def split_heads(x):
        return x.reshape(B, S, num_heads, d_k).transpose(0, 2, 1, 3)

    qp = split_heads(lin(q, params["wq"], params["bq"]))
    kp = split_heads(lin(k, params["wk"], params["bk"]))
    vp = split_heads(lin(v, params["wv"], params["bv"]))

    scores = jnp.einsum("bhqd,bhkd->bhqk", qp, kp) / math.sqrt(d_k)
    scores = jnp.where(mask[:, None, :, :] == 0, -1e9, scores)
    p = jax.nn.softmax(scores, axis=-1)
    ctx = jnp.einsum("bhqk,bhkd->bhqd", p, vp)
    ctx = ctx.transpose(0, 2, 1, 3).reshape(B, S, D)
    return lin(ctx, params["wo"], params["bo"])


if __name__ == "__main__":
    B, S, D, H = 2, 8, 32, 4  # batch, seq, d_model, heads

    key = jax.random.PRNGKey(0)
    ks = jax.random.split(key, 11)
    bound = 1.0 / math.sqrt(D)  # nn.Linear default init range

    params = {
        "wq": jax.random.uniform(ks[0], (D, D), jnp.float32, -bound, bound),
        "bq": jax.random.uniform(ks[1], (D,), jnp.float32, -bound, bound),
        "wk": jax.random.uniform(ks[2], (D, D), jnp.float32, -bound, bound),
        "bk": jax.random.uniform(ks[3], (D,), jnp.float32, -bound, bound),
        "wv": jax.random.uniform(ks[4], (D, D), jnp.float32, -bound, bound),
        "bv": jax.random.uniform(ks[5], (D,), jnp.float32, -bound, bound),
        "wo": jax.random.uniform(ks[6], (D, D), jnp.float32, -bound, bound),
        "bo": jax.random.uniform(ks[7], (D,), jnp.float32, -bound, bound),
    }

    q = jax.random.normal(ks[8], (B, S, D), jnp.float32)
    k = jax.random.normal(ks[9], (B, S, D), jnp.float32)
    v = jax.random.normal(ks[10], (B, S, D), jnp.float32)

    # Causal mask (B, S, S): nonzero = attend, 0 = masked.
    mask = jnp.broadcast_to(jnp.tril(jnp.ones((S, S), jnp.int32)), (B, S, S))

    prepared = prepare_params(params, num_heads=H)   # one-time weight prep
    ref = _reference_mha(q, k, v, mask, params, num_heads=H)

    # Path 1: causal mask built in-kernel (no mask DMA).
    mha_causal = jax.jit(functools.partial(
        multi_headed_attention, num_heads=H, causal=True))
    out = jax.block_until_ready(mha_causal(q, k, v, prepared))
    assert out.shape == (B, S, D)
    # bf16 MXU operands -> slightly looser tolerance than the f32 reference.
    assert jnp.allclose(out, ref, rtol=3e-2, atol=3e-2), "causal path mismatch"

    # Path 2: explicit (data-dependent) mask DMA'd into the kernel.
    mha_masked = jax.jit(functools.partial(multi_headed_attention, num_heads=H))
    out2 = jax.block_until_ready(mha_masked(q, k, v, prepared, mask=mask))
    assert jnp.allclose(out2, ref, rtol=3e-2, atol=3e-2), "masked path mismatch"

    print("KERNEL_OK")
</pallas_src>

<mosaic_0001>
module attributes {stable_mosaic.version = 11 : i64} {
  func.func @_mha_kernel(%arg0: i32, %arg1: memref<1x8x32xbf16, #tpu.memory_space<vmem>>, %arg2: memref<1x8x32xbf16, #tpu.memory_space<vmem>>, %arg3: memref<1x8x32xbf16, #tpu.memory_space<vmem>>, %arg4: memref<3x32x32xbf16, #tpu.memory_space<vmem>>, %arg5: memref<3x1x32xf32, #tpu.memory_space<vmem>>, %arg6: memref<4x8x32xbf16, #tpu.memory_space<vmem>>, %arg7: memref<1x32xf32, #tpu.memory_space<vmem>>, %arg8: memref<1x8x32xf32, #tpu.memory_space<vmem>>) attributes {dimension_semantics = [#tpu.dimension_semantics<parallel>], iteration_bounds = array<i64: 2>, scalar_prefetch = 0 : i64, scratch_operands = 0 : i64, tpu.core_type = #tpu.core_type<tc>, window_params = [{transform_indices = @transform_0, window_bounds = array<i64: 1, 8, 32>}, {transform_indices = @transform_1, window_bounds = array<i64: 1, 8, 32>}, {transform_indices = @transform_2, window_bounds = array<i64: 1, 8, 32>}, {pipeline_mode = #tpu.pipeline_mode<synchronous>, transform_indices = @transform_3, window_bounds = array<i64: 3, 32, 32>}, {pipeline_mode = #tpu.pipeline_mode<synchronous>, transform_indices = @transform_4, window_bounds = array<i64: 3, 1, 32>}, {pipeline_mode = #tpu.pipeline_mode<synchronous>, transform_indices = @transform_5, window_bounds = array<i64: 4, 8, 32>}, {pipeline_mode = #tpu.pipeline_mode<synchronous>, transform_indices = @transform_6, window_bounds = array<i64: 1, 32>}, {transform_indices = @transform_7, window_bounds = array<i64: 1, 8, 32>}]} {
    %c0 = arith.constant 0 : index
    %c0_0 = arith.constant 0 : index
    %c0_1 = arith.constant 0 : index
    %0 = vector.load %arg1[%c0, %c0_0, %c0_1] : memref<1x8x32xbf16, #tpu.memory_space<vmem>>, vector<1x8x32xbf16>
    %1 = vector.shape_cast %0 : vector<1x8x32xbf16> to vector<8x32xbf16>
    %c0_2 = arith.constant 0 : index
    %c0_3 = arith.constant 0 : index
    %c0_4 = arith.constant 0 : index
    %2 = vector.load %arg2[%c0_2, %c0_3, %c0_4] : memref<1x8x32xbf16, #tpu.memory_space<vmem>>, vector<1x8x32xbf16>
    %3 = vector.shape_cast %2 : vector<1x8x32xbf16> to vector<8x32xbf16>
    %c0_5 = arith.constant 0 : index
    %c0_6 = arith.constant 0 : index
    %c0_7 = arith.constant 0 : index
    %4 = vector.load %arg3[%c0_5, %c0_6, %c0_7] : memref<1x8x32xbf16, #tpu.memory_space<vmem>>, vector<1x8x32xbf16>
    %5 = vector.shape_cast %4 : vector<1x8x32xbf16> to vector<8x32xbf16>
    %c0_8 = arith.constant 0 : index
    %c0_9 = arith.constant 0 : index
    %c0_10 = arith.constant 0 : index
    %6 = vector.load %arg4[%c0_8, %c0_9, %c0_10] : memref<3x32x32xbf16, #tpu.memory_space<vmem>>, vector<1x32x32xbf16>
    %7 = vector.shape_cast %6 : vector<1x32x32xbf16> to vector<32x32xbf16>
    %cst = arith.constant dense<0.000000e+00> : vector<8x32xf32>
    %8 = tpu.matmul %1, %7, %cst {dimension_numbers = #tpu.dot_dimension_numbers<[1], [0], [0], [1], [0, 0, 1, 1], [], []>} : vector<8x32xbf16>, vector<32x32xbf16>, vector<8x32xf32> -> vector<8x32xf32>
    %c0_11 = arith.constant 0 : index
    %c0_12 = arith.constant 0 : index
    %c0_13 = arith.constant 0 : index
    %9 = vector.load %arg5[%c0_11, %c0_12, %c0_13] : memref<3x1x32xf32, #tpu.memory_space<vmem>>, vector<1x1x32xf32>
    %10 = vector.shape_cast %9 : vector<1x1x32xf32> to vector<1x32xf32>
    %11 = vector.broadcast %10 : vector<1x32xf32> to vector<8x32xf32>
    %12 = arith.addf %8, %11 : vector<8x32xf32>
    %13 = arith.truncf %12 : vector<8x32xf32> to vector<8x32xbf16>
    %c1 = arith.constant 1 : index
    %c0_14 = arith.constant 0 : index
    %c0_15 = arith.constant 0 : index
    %14 = vector.load %arg4[%c1, %c0_14, %c0_15] : memref<3x32x32xbf16, #tpu.memory_space<vmem>>, vector<1x32x32xbf16>
    %15 = vector.shape_cast %14 : vector<1x32x32xbf16> to vector<32x32xbf16>
    %cst_16 = arith.constant dense<0.000000e+00> : vector<8x32xf32>
    %16 = tpu.matmul %3, %15, %cst_16 {dimension_numbers = #tpu.dot_dimension_numbers<[1], [0], [0], [1], [0, 0, 1, 1], [], []>} : vector<8x32xbf16>, vector<32x32xbf16>, vector<8x32xf32> -> vector<8x32xf32>
    %c1_17 = arith.constant 1 : index
    %c0_18 = arith.constant 0 : index
    %c0_19 = arith.constant 0 : index
    %17 = vector.load %arg5[%c1_17, %c0_18, %c0_19] : memref<3x1x32xf32, #tpu.memory_space<vmem>>, vector<1x1x32xf32>
    %18 = vector.shape_cast %17 : vector<1x1x32xf32> to vector<1x32xf32>
    %19 = vector.broadcast %18 : vector<1x32xf32> to vector<8x32xf32>
    %20 = arith.addf %16, %19 : vector<8x32xf32>
    %21 = arith.truncf %20 : vector<8x32xf32> to vector<8x32xbf16>
    %c2 = arith.constant 2 : index
    %c0_20 = arith.constant 0 : index
    %c0_21 = arith.constant 0 : index
    %22 = vector.load %arg4[%c2, %c0_20, %c0_21] : memref<3x32x32xbf16, #tpu.memory_space<vmem>>, vector<1x32x32xbf16>
    %23 = vector.shape_cast %22 : vector<1x32x32xbf16> to vector<32x32xbf16>
    %cst_22 = arith.constant dense<0.000000e+00> : vector<8x32xf32>
    %24 = tpu.matmul %5, %23, %cst_22 {dimension_numbers = #tpu.dot_dimension_numbers<[1], [0], [0], [1], [0, 0, 1, 1], [], []>} : vector<8x32xbf16>, vector<32x32xbf16>, vector<8x32xf32> -> vector<8x32xf32>
    %c2_23 = arith.constant 2 : index
    %c0_24 = arith.constant 0 : index
    %c0_25 = arith.constant 0 : index
    %25 = vector.load %arg5[%c2_23, %c0_24, %c0_25] : memref<3x1x32xf32, #tpu.memory_space<vmem>>, vector<1x1x32xf32>
    %26 = vector.shape_cast %25 : vector<1x1x32xf32> to vector<1x32xf32>
    %27 = vector.broadcast %26 : vector<1x32xf32> to vector<8x32xf32>
    %28 = arith.addf %24, %27 : vector<8x32xf32>
    %29 = arith.truncf %28 : vector<8x32xf32> to vector<8x32xbf16>
    %30 = tpu.iota {dimensions = array<i32: 0>} : vector<8x8xi32>
    %31 = tpu.iota {dimensions = array<i32: 1>} : vector<8x8xi32>
    %32 = arith.cmpi sge, %30, %31 : vector<8x8xi32>
    %33 = vector.extract_strided_slice %13 {offsets = [0, 0], sizes = [8, 8], strides = [1, 1]} : vector<8x32xbf16> to vector<8x8xbf16>
    %34 = vector.extract_strided_slice %21 {offsets = [0, 0], sizes = [8, 8], strides = [1, 1]} : vector<8x32xbf16> to vector<8x8xbf16>
    %35 = vector.extract_strided_slice %29 {offsets = [0, 0], sizes = [8, 8], strides = [1, 1]} : vector<8x32xbf16> to vector<8x8xbf16>
    %cst_26 = arith.constant dense<0.000000e+00> : vector<8x8xf32>
    %36 = tpu.matmul %33, %34, %cst_26 {dimension_numbers = #tpu.dot_dimension_numbers<[1], [1], [0], [0], [0, 0, 1, 0], [], []>} : vector<8x8xbf16>, vector<8x8xbf16>, vector<8x8xf32> -> vector<8x8xf32>
    %cst_27 = arith.constant -1.000000e+09 : f32
    %37 = vector.broadcast %cst_27 : f32 to vector<8x8xf32>
    %38 = arith.select %32, %36, %37 : vector<8x8xi1>, vector<8x8xf32>
    %cst_28 = arith.constant dense<0xFF800000> : vector<8xf32>
    %39 = vector.multi_reduction <maximumf>, %38, %cst_28 [1] : vector<8x8xf32> to vector<8xf32>
    %40 = vector.shape_cast %39 : vector<8xf32> to vector<8x1xf32>
    %41 = vector.broadcast %40 : vector<8x1xf32> to vector<8x8xf32>
    %42 = arith.subf %38, %41 : vector<8x8xf32>
    %43 = math.exp %42 : vector<8x8xf32>
    %cst_29 = arith.constant dense<0.000000e+00> : vector<8xf32>
    %44 = vector.multi_reduction <add>, %43, %cst_29 [1] : vector<8x8xf32> to vector<8xf32>
    %45 = vector.shape_cast %44 : vector<8xf32> to vector<8x1xf32>
    %46 = arith.truncf %43 : vector<8x8xf32> to vector<8x8xbf16>
    %cst_30 = arith.constant dense<0.000000e+00> : vector<8x8xf32>
    %47 = tpu.matmul %46, %35, %cst_30 {dimension_numbers = #tpu.dot_dimension_numbers<[1], [0], [0], [1], [0, 0, 1, 1], [], []>} : vector<8x8xbf16>, vector<8x8xbf16>, vector<8x8xf32> -> vector<8x8xf32>
    %48 = vector.broadcast %45 : vector<8x1xf32> to vector<8x8xf32>
    %49 = arith.divf %47, %48 : vector<8x8xf32>
    %50 = arith.truncf %49 : vector<8x8xf32> to vector<8x8xbf16>
    %c0_31 = arith.constant 0 : index
    %c0_32 = arith.constant 0 : index
    %c0_33 = arith.constant 0 : index
    %51 = vector.load %arg6[%c0_31, %c0_32, %c0_33] : memref<4x8x32xbf16, #tpu.memory_space<vmem>>, vector<1x8x32xbf16>
    %52 = vector.shape_cast %51 : vector<1x8x32xbf16> to vector<8x32xbf16>
    %cst_34 = arith.constant dense<0.000000e+00> : vector<8x32xf32>
    %53 = tpu.matmul %50, %52, %cst_34 {dimension_numbers = #tpu.dot_dimension_numbers<[1], [0], [0], [1], [0, 0, 1, 1], [], []>} : vector<8x8xbf16>, vector<8x32xbf16>, vector<8x32xf32> -> vector<8x32xf32>
    %54 = vector.extract_strided_slice %13 {offsets = [0, 8], sizes = [8, 8], strides = [1, 1]} : vector<8x32xbf16> to vector<8x8xbf16>
    %55 = vector.extract_strided_slice %21 {offsets = [0, 8], sizes = [8, 8], strides = [1, 1]} : vector<8x32xbf16> to vector<8x8xbf16>
    %56 = vector.extract_strided_slice %29 {offsets = [0, 8], sizes = [8, 8], strides = [1, 1]} : vector<8x32xbf16> to vector<8x8xbf16>
    %cst_35 = arith.constant dense<0.000000e+00> : vector<8x8xf32>
    %57 = tpu.matmul %54, %55, %cst_35 {dimension_numbers = #tpu.dot_dimension_numbers<[1], [1], [0], [0], [0, 0, 1, 0], [], []>} : vector<8x8xbf16>, vector<8x8xbf16>, vector<8x8xf32> -> vector<8x8xf32>
    %cst_36 = arith.constant -1.000000e+09 : f32
    %58 = vector.broadcast %cst_36 : f32 to vector<8x8xf32>
    %59 = arith.select %32, %57, %58 : vector<8x8xi1>, vector<8x8xf32>
    %cst_37 = arith.constant dense<0xFF800000> : vector<8xf32>
    %60 = vector.multi_reduction <maximumf>, %59, %cst_37 [1] : vector<8x8xf32> to vector<8xf32>
    %61 = vector.shape_cast %60 : vector<8xf32> to vector<8x1xf32>
    %62 = vector.broadcast %61 : vector<8x1xf32> to vector<8x8xf32>
    %63 = arith.subf %59, %62 : vector<8x8xf32>
    %64 = math.exp %63 : vector<8x8xf32>
    %cst_38 = arith.constant dense<0.000000e+00> : vector<8xf32>
    %65 = vector.multi_reduction <add>, %64, %cst_38 [1] : vector<8x8xf32> to vector<8xf32>
    %66 = vector.shape_cast %65 : vector<8xf32> to vector<8x1xf32>
    %67 = arith.truncf %64 : vector<8x8xf32> to vector<8x8xbf16>
    %cst_39 = arith.constant dense<0.000000e+00> : vector<8x8xf32>
    %68 = tpu.matmul %67, %56, %cst_39 {dimension_numbers = #tpu.dot_dimension_numbers<[1], [0], [0], [1], [0, 0, 1, 1], [], []>} : vector<8x8xbf16>, vector<8x8xbf16>, vector<8x8xf32> -> vector<8x8xf32>
    %69 = vector.broadcast %66 : vector<8x1xf32> to vector<8x8xf32>
    %70 = arith.divf %68, %69 : vector<8x8xf32>
    %71 = arith.truncf %70 : vector<8x8xf32> to vector<8x8xbf16>
    %c1_40 = arith.constant 1 : index
    %c0_41 = arith.constant 0 : index
    %c0_42 = arith.constant 0 : index
    %72 = vector.load %arg6[%c1_40, %c0_41, %c0_42] : memref<4x8x32xbf16, #tpu.memory_space<vmem>>, vector<1x8x32xbf16>
    %73 = vector.shape_cast %72 : vector<1x8x32xbf16> to vector<8x32xbf16>
    %cst_43 = arith.constant dense<0.000000e+00> : vector<8x32xf32>
    %74 = tpu.matmul %71, %73, %cst_43 {dimension_numbers = #tpu.dot_dimension_numbers<[1], [0], [0], [1], [0, 0, 1, 1], [], []>} : vector<8x8xbf16>, vector<8x32xbf16>, vector<8x32xf32> -> vector<8x32xf32>
    %75 = arith.addf %53, %74 : vector<8x32xf32>
    %76 = vector.extract_strided_slice %13 {offsets = [0, 16], sizes = [8, 8], strides = [1, 1]} : vector<8x32xbf16> to vector<8x8xbf16>
    %77 = vector.extract_strided_slice %21 {offsets = [0, 16], sizes = [8, 8], strides = [1, 1]} : vector<8x32xbf16> to vector<8x8xbf16>
    %78 = vector.extract_strided_slice %29 {offsets = [0, 16], sizes = [8, 8], strides = [1, 1]} : vector<8x32xbf16> to vector<8x8xbf16>
    %cst_44 = arith.constant dense<0.000000e+00> : vector<8x8xf32>
    %79 = tpu.matmul %76, %77, %cst_44 {dimension_numbers = #tpu.dot_dimension_numbers<[1], [1], [0], [0], [0, 0, 1, 0], [], []>} : vector<8x8xbf16>, vector<8x8xbf16>, vector<8x8xf32> -> vector<8x8xf32>
    %cst_45 = arith.constant -1.000000e+09 : f32
    %80 = vector.broadcast %cst_45 : f32 to vector<8x8xf32>
    %81 = arith.select %32, %79, %80 : vector<8x8xi1>, vector<8x8xf32>
    %cst_46 = arith.constant dense<0xFF800000> : vector<8xf32>
    %82 = vector.multi_reduction <maximumf>, %81, %cst_46 [1] : vector<8x8xf32> to vector<8xf32>
    %83 = vector.shape_cast %82 : vector<8xf32> to vector<8x1xf32>
    %84 = vector.broadcast %83 : vector<8x1xf32> to vector<8x8xf32>
    %85 = arith.subf %81, %84 : vector<8x8xf32>
    %86 = math.exp %85 : vector<8x8xf32>
    %cst_47 = arith.constant dense<0.000000e+00> : vector<8xf32>
    %87 = vector.multi_reduction <add>, %86, %cst_47 [1] : vector<8x8xf32> to vector<8xf32>
    %88 = vector.shape_cast %87 : vector<8xf32> to vector<8x1xf32>
    %89 = arith.truncf %86 : vector<8x8xf32> to vector<8x8xbf16>
    %cst_48 = arith.constant dense<0.000000e+00> : vector<8x8xf32>
    %90 = tpu.matmul %89, %78, %cst_48 {dimension_numbers = #tpu.dot_dimension_numbers<[1], [0], [0], [1], [0, 0, 1, 1], [], []>} : vector<8x8xbf16>, vector<8x8xbf16>, vector<8x8xf32> -> vector<8x8xf32>
    %91 = vector.broadcast %88 : vector<8x1xf32> to vector<8x8xf32>
    %92 = arith.divf %90, %91 : vector<8x8xf32>
    %93 = arith.truncf %92 : vector<8x8xf32> to vector<8x8xbf16>
    %c2_49 = arith.constant 2 : index
    %c0_50 = arith.constant 0 : index
    %c0_51 = arith.constant 0 : index
    %94 = vector.load %arg6[%c2_49, %c0_50, %c0_51] : memref<4x8x32xbf16, #tpu.memory_space<vmem>>, vector<1x8x32xbf16>
    %95 = vector.shape_cast %94 : vector<1x8x32xbf16> to vector<8x32xbf16>
    %cst_52 = arith.constant dense<0.000000e+00> : vector<8x32xf32>
    %96 = tpu.matmul %93, %95, %cst_52 {dimension_numbers = #tpu.dot_dimension_numbers<[1], [0], [0], [1], [0, 0, 1, 1], [], []>} : vector<8x8xbf16>, vector<8x32xbf16>, vector<8x32xf32> -> vector<8x32xf32>
    %97 = arith.addf %75, %96 : vector<8x32xf32>
    %98 = vector.extract_strided_slice %13 {offsets = [0, 24], sizes = [8, 8], strides = [1, 1]} : vector<8x32xbf16> to vector<8x8xbf16>
    %99 = vector.extract_strided_slice %21 {offsets = [0, 24], sizes = [8, 8], strides = [1, 1]} : vector<8x32xbf16> to vector<8x8xbf16>
    %100 = vector.extract_strided_slice %29 {offsets = [0, 24], sizes = [8, 8], strides = [1, 1]} : vector<8x32xbf16> to vector<8x8xbf16>
    %cst_53 = arith.constant dense<0.000000e+00> : vector<8x8xf32>
    %101 = tpu.matmul %98, %99, %cst_53 {dimension_numbers = #tpu.dot_dimension_numbers<[1], [1], [0], [0], [0, 0, 1, 0], [], []>} : vector<8x8xbf16>, vector<8x8xbf16>, vector<8x8xf32> -> vector<8x8xf32>
    %cst_54 = arith.constant -1.000000e+09 : f32
    %102 = vector.broadcast %cst_54 : f32 to vector<8x8xf32>
    %103 = arith.select %32, %101, %102 : vector<8x8xi1>, vector<8x8xf32>
    %cst_55 = arith.constant dense<0xFF800000> : vector<8xf32>
    %104 = vector.multi_reduction <maximumf>, %103, %cst_55 [1] : vector<8x8xf32> to vector<8xf32>
    %105 = vector.shape_cast %104 : vector<8xf32> to vector<8x1xf32>
    %106 = vector.broadcast %105 : vector<8x1xf32> to vector<8x8xf32>
    %107 = arith.subf %103, %106 : vector<8x8xf32>
    %108 = math.exp %107 : vector<8x8xf32>
    %cst_56 = arith.constant dense<0.000000e+00> : vector<8xf32>
    %109 = vector.multi_reduction <add>, %108, %cst_56 [1] : vector<8x8xf32> to vector<8xf32>
    %110 = vector.shape_cast %109 : vector<8xf32> to vector<8x1xf32>
    %111 = arith.truncf %108 : vector<8x8xf32> to vector<8x8xbf16>
    %cst_57 = arith.constant dense<0.000000e+00> : vector<8x8xf32>
    %112 = tpu.matmul %111, %100, %cst_57 {dimension_numbers = #tpu.dot_dimension_numbers<[1], [0], [0], [1], [0, 0, 1, 1], [], []>} : vector<8x8xbf16>, vector<8x8xbf16>, vector<8x8xf32> -> vector<8x8xf32>
    %113 = vector.broadcast %110 : vector<8x1xf32> to vector<8x8xf32>
    %114 = arith.divf %112, %113 : vector<8x8xf32>
    %115 = arith.truncf %114 : vector<8x8xf32> to vector<8x8xbf16>
    %c3 = arith.constant 3 : index
    %c0_58 = arith.constant 0 : index
    %c0_59 = arith.constant 0 : index
    %116 = vector.load %arg6[%c3, %c0_58, %c0_59] : memref<4x8x32xbf16, #tpu.memory_space<vmem>>, vector<1x8x32xbf16>
    %117 = vector.shape_cast %116 : vector<1x8x32xbf16> to vector<8x32xbf16>
    %cst_60 = arith.constant dense<0.000000e+00> : vector<8x32xf32>
    %118 = tpu.matmul %115, %117, %cst_60 {dimension_numbers = #tpu.dot_dimension_numbers<[1], [0], [0], [1], [0, 0, 1, 1], [], []>} : vector<8x8xbf16>, vector<8x32xbf16>, vector<8x32xf32> -> vector<8x32xf32>
    %119 = arith.addf %97, %118 : vector<8x32xf32>
    %c0_61 = arith.constant 0 : index
    %c0_62 = arith.constant 0 : index
    %120 = vector.load %arg7[%c0_61, %c0_62] : memref<1x32xf32, #tpu.memory_space<vmem>>, vector<1x32xf32>
    %121 = vector.broadcast %120 : vector<1x32xf32> to vector<8x32xf32>
    %122 = arith.addf %119, %121 : vector<8x32xf32>
    %c0_63 = arith.constant 0 : index
    %c0_64 = arith.constant 0 : index
    %c0_65 = arith.constant 0 : index
    %123 = vector.load %arg8[%c0_63, %c0_64, %c0_65] : memref<1x8x32xf32, #tpu.memory_space<vmem>>, vector<1x8x32xf32>
    %124 = vector.shape_cast %123 : vector<1x8x32xf32> to vector<8x32xf32>
    %125 = vector.shape_cast %122 : vector<8x32xf32> to vector<1x8x32xf32>
    tpu.vector_store %arg8[%c0_63, %c0_64, %c0_65], %125 {strides = array<i32>} : memref<1x8x32xf32, #tpu.memory_space<vmem>>, vector<1x8x32xf32>,
    return
  }
  func.func @transform_0(%arg0: i32) -> (i32, i32, i32) {
    %c0_i32 = arith.constant 0 : i32
    %c0_i32_0 = arith.constant 0 : i32
    %c0_i32_1 = arith.constant 0 : i32
    return %arg0, %c0_i32, %c0_i32_0 : i32, i32, i32
  }
  func.func @transform_1(%arg0: i32) -> (i32, i32, i32) {
    %c0_i32 = arith.constant 0 : i32
    %c0_i32_0 = arith.constant 0 : i32
    %c0_i32_1 = arith.constant 0 : i32
    return %arg0, %c0_i32, %c0_i32_0 : i32, i32, i32
  }
  func.func @transform_2(%arg0: i32) -> (i32, i32, i32) {
    %c0_i32 = arith.constant 0 : i32
    %c0_i32_0 = arith.constant 0 : i32
    %c0_i32_1 = arith.constant 0 : i32
    return %arg0, %c0_i32, %c0_i32_0 : i32, i32, i32
  }
  func.func @transform_3(%arg0: i32) -> (i32, i32, i32) {
    %c0_i32 = arith.constant 0 : i32
    %c0_i32_0 = arith.constant 0 : i32
    %c0_i32_1 = arith.constant 0 : i32
    %c0_i32_2 = arith.constant 0 : i32
    return %c0_i32, %c0_i32_0, %c0_i32_1 : i32, i32, i32
  }
  func.func @transform_4(%arg0: i32) -> (i32, i32, i32) {
    %c0_i32 = arith.constant 0 : i32
    %c0_i32_0 = arith.constant 0 : i32
    %c0_i32_1 = arith.constant 0 : i32
    %c0_i32_2 = arith.constant 0 : i32
    return %c0_i32, %c0_i32_0, %c0_i32_1 : i32, i32, i32
  }
  func.func @transform_5(%arg0: i32) -> (i32, i32, i32) {
    %c0_i32 = arith.constant 0 : i32
    %c0_i32_0 = arith.constant 0 : i32
    %c0_i32_1 = arith.constant 0 : i32
    %c0_i32_2 = arith.constant 0 : i32
    return %c0_i32, %c0_i32_0, %c0_i32_1 : i32, i32, i32
  }
  func.func @transform_6(%arg0: i32) -> (i32, i32) {
    %c0_i32 = arith.constant 0 : i32
    %c0_i32_0 = arith.constant 0 : i32
    %c0_i32_1 = arith.constant 0 : i32
    return %c0_i32, %c0_i32_0 : i32, i32
  }
  func.func @transform_7(%arg0: i32) -> (i32, i32, i32) {
    %c0_i32 = arith.constant 0 : i32
    %c0_i32_0 = arith.constant 0 : i32
    %c0_i32_1 = arith.constant 0 : i32
    return %arg0, %c0_i32, %c0_i32_0 : i32, i32, i32
  }
}

</mosaic_0001>

<bundles_post_ra>
// kernel: multi_headed_attention.1
= control target key start
LH: loop header
LB: loop body
LE: loop exit
PB: predicated region body
PF: predicated region fallthrough
CT: control target
= control target key end

     0   :  { %12 = vsyncpa [#allocation3], 0  ;;  %s1425_s0 = inlined_call_operand.vmem [shape: bf16[2,8,32], index: 0, kind: input, shape index: {}]   ;;  %s1426_s1 = inlined_call_operand.vmem [shape: bf16[2,8,32], index: 1, kind: input, shape index: {}]   ;;  %s1427_s2 = inlined_call_operand.vmem [shape: bf16[2,8,32], index: 2, kind: input, shape index: {}]   ;;  %s1428_s3 = inlined_call_operand.hbm [shape: bf16[3,32,32], index: 3, kind: input, shape index: {}]   ;;  %s1429_s4 = inlined_call_operand.vmem [shape: f32[3,1,32], index: 4, kind: input, shape index: {}]   ;;  %s1430_s5 = inlined_call_operand.vmem [shape: bf16[4,8,32], index: 5, kind: input, shape index: {}]   ;;  %s1431_s6 = inlined_call_operand.vmem [shape: f32[1,32], index: 6, kind: input, shape index: {}]   ;;  %s1432_s7 = inlined_call_operand.hbm [shape: f32[2,8,32], index: 7, kind: output, shape index: {}]  }
   0x1   :  { %13 = vsyncpa [#allocation4], 0 }
   0x2   :  { %15 = vsyncpa [#allocation4 + $0x1], 0  ;;  %s1224_s24 = smov 0   ;;  %s1226_s25 = smov 0  }
   0x3   :  { %s1228_s26 = smov 0   ;;  %s1230_s27 = smov 0  }
   0x4 LB: > { %s1245_s28 = sadd.s32 4294967295, %s1176_s27   ;;  %s941_s29 = sadd.s32 4294967294, %s1176_s27   ;;  %s1176_s27 = sphi %s1230_s27, %s1438_s27   ;;  %s1172_s26 = sphi %s1228_s26, %s1437_s26   ;;  %s1168_s25 = sphi %s1226_s25, %s1436_s25   ;;  %s1164_s24 = sphi %s1224_s24, %s1435_s24  }
   0x5   : > { %s1249_s30 = sadd.s32 1, %s1176_s27   ;;  %s190_s8 = sadd.s32 1, %s1172_s26 }
   0x6   : > { %s187_s9 = ssub.s32 %s1176_s27, %s1249_s30  ;;  %p200_p0 = scmp.ne.s32.totalorder %s1172_s26, %s1168_s25 }
   0x7   : > { %p188_p1 = scmp.eq.s32.totalorder %s187_s9, 0  ;;  %p201_p2 = scmp.eq.s32.totalorder %s1245_s28, 1 }
   0x8   : > { %p206_p3 = scmp.ne.s32.totalorder %s1168_s25, %s1164_s24  ;;  %p207_p4 = scmp.eq.s32.totalorder %s941_s29, 1 }
   0x9   : > { %s1260_s10 = scalar_select %p188_p1, %s1172_s26, %s190_s8  }
   0xa   : > { %p1262_p5 = por %p201_p2, %p200_p0  ;;  %p1266_p6 = por %p207_p4, %p206_p3 }
   0xb   : > { %p942_p7 = scmp.ge.s32.totalorder %s1176_s27, 1  ;;  %p214_p8 = scmp.lt.s32.totalorder %s1176_s27, 3 }
   0xc   : > { %p1019_p9 = scmp.eq.s32.totalorder %s1245_s28, 0  ;;  %s225_s15 = sshll.u32 %s1428_s3, 4  ;;  %s226_s15 = int_to_ptr.hbm [resolvable:$true] %s225_s15 }
   0xd   : > { %p215_p10 = pnand %p942_p7, %p214_p8  ;;  %s1178_s16 = smov [#allocation2]  }
   0xe   : > { %s227_s17 = sshll.u32 %s1178_s16, 4  ;;  %s1179_s18 = smov 64   ;;  %s228_s17 = int_to_ptr.vmem [resolvable:$true] %s227_s17 }
   0xf   : > { %p1011_p11 = pneg %p215_p10  ;;  %s1180_s19 = smov 4  }
  0x10   : > { %273 = sbr.rel (%p215_p10) target bundleno = 1116 (0x45c), region = 48 }
  0x11   : > { %p1012_p12 = pnand %p1019_p9, %p1011_p11 }
  0x13   : > { %1014 = dma.hbm_to_vmem [thread:$0]  (!%p1012_p12), %s226_s15, 768, %s228_s17, [#allocation3], %s1179_s18, %s1179_s18, %s1180_s19  }
  0x15   : > { %1155 = dma.done.wait (%p1019_p9), [#allocation3], 768  }
  0x16   : > { %1157 = vsyncadd (%p1019_p9), [#allocation3], 4294966528  ;;  %p313_p13 = scmp.lt.s32.totalorder %s1245_s28, 1  ;;  %v1000_v0 = vld [vmem:[#allocation2 + $0x8] sm:$0xff]  ;;  %v1002_v1 = vld [vmem:[#allocation2 + $0x18] sm:$0xff]  ;;  %vm349_vm0 = vcmask 261120   ;;  %v445_v29 = vlaneseq }
  0x17   : > { %v999_v2 = vld [vmem:[#allocation2] sm:$0xff]  ;;  %359 = vmatpush.bf16.msra.mxu0 %v1000_v0  ;;  %398 = vmatpush.bf16.msra.mxu1 %v1002_v1  ;;  %v1001_v3 = vld [vmem:[#allocation2 + $0x10] sm:$0xff]  ;;  %vm450_vm1 = vcmask 64512   ;;  %s1181_s18 = smov 112   ;;  %s1182_s19 = smov 120   ;;  %v1004_v21 = vld [vmem:[#allocation2 + $0x28] sm:$0xff] }
  0x18   : > { %s314_s20 = scalar_select %p313_p13, %s1245_s28, 1  ;;  %v1060_v6 = vld [vmem:[%s1429_s4] ss:$0 sm:$0xff]  ;;  %v1061_v7 = vld [vmem:[%s1429_s4 + $0x1] ss:$0 sm:$0xff]  ;;  %437 = vmatpush.bf16.msra.mxu2 %v1004_v21  ;;  %v1317_v30 = vshrl.u32 %v445_v29, 7 }
  0x19   : > { %v1003_v22 = vld [vmem:[#allocation2 + $0x20] sm:$0xff]  ;;  %v1319_v31 = vand.u32 127, %v445_v29  ;;  %vm484_vm3 = vcmask 1043456   ;;  %s996_s23 = sshll.u32 %s1245_s28, 3 }
  0x1a   : > { %s1284_s21 = sshll.u32 %s314_s20, 2  ;;  %s1183_s20 = smov 104   ;;  %v1062_v36 = vld [vmem:[%s1429_s4 + $0x2] ss:$0 sm:$0xff] }
  0x1b   : > { %s316_s29 = scalar_lea.vmem %s1425_s0, %s1284_s21  ;;  %s320_s13 = scalar_lea.vmem %s1426_s1, %s1284_s21  ;;  %360 = vmatpush.bf16.msra.mxu0 %v999_v2  ;;  %399 = vmatpush.bf16.msra.mxu1 %v1001_v3  ;;  %vm449_vm2 = vcmp.ge.s32.totalorder %v1317_v30, %v1319_v31  ;;  %v517_v43 = vld [vmem:[%s1430_s5] sm:$0xf] }
  0x1c   : > { %v326_v4 = vld [vmem:[%s316_s29] sm:$0xf]  ;;  %438 = vmatpush.bf16.msra.mxu2 %v1003_v22  ;;  %s324_s29 = scalar_lea.vmem %s1427_s2, %s1284_s21  ;;  %v623_v45 = vsel %vm484_vm3, %v517_v43, 0  ;;  %s841_s8 = scalar_lea.hbm %s1432_s7, %s996_s23 }
  0x1d   : > { %v327_v5 = vld [vmem:[%s320_s13] sm:$0xf]  ;;  %s845_s16 = sshll.u32 %s841_s8, 4  ;;  %s846_s16 = int_to_ptr.hbm [resolvable:$true] %s845_s16 }
  0x1e   : > { %959 = vmatmul.msk.bf16.vlgmr.msra.gmra.mxu0 %vm349_vm0, %v326_v4  ;;  %969 = vmatmul.msk.bf16.vlgmr.msra.gmra.mxu1 %vm349_vm0, %v327_v5  ;;  %v328_v23 = vld [vmem:[%s324_s29] sm:$0xf]  ;;  %s1124_s17 = sshra.s32 %s846_s16, 4  ;;  %s1125_s17 = int_to_ptr.hbm [resolvable:$true] %s1124_s17 }
  0x1f   : > { %979 = vmatmul.msk.bf16.vlgmr.msra.gmra.mxu2 %vm349_vm0, %v328_v23  ;;  %p1131_p3 = scmp.lt.s32.totalorder %s1125_s17, %s1432_s7 }
  0x9b   : > { %v362_v8 = vpop.f32.mrf.mxu0  ;;  %v401_v9 = vpop.f32.mrf.mxu1 }
  0x9c   : > { %v363_v10 = vadd.f32 %v1060_v6, %v362_v8  ;;  %v402_v11 = vadd.f32 %v1061_v7, %v401_v9 }
  0x9e   : > { %v405_v12 = vpack.c.bf16 %v402_v11, %v402_v11  ;;  %v366_v13 = vpack.c.bf16 %v363_v10, %v363_v10 }
  0xa0   : > { %v524_v14 = vunpack.c.l.b16 %v405_v12  ;;  %v455_v15 = vsel %vm450_vm1, %v405_v12, 0  ;;  %v519_v19 = vunpack.c.l.b16 %v366_v13 }
  0xa1   : > { %464 = vmatpush.bf16.xpose.msra.mxu3 %v455_v15 }
  0xa2   : > { %v525_v16 = vpack.c.b16 %v524_v14, %v524_v14  ;;  %v520_v20 = vpack.c.b16 %v519_v19, %v519_v19  ;;  %v440_v37 = vpop.f32.mrf.mxu2 }
  0xa3   : > { %v364_v17 = vpop.f32.mrf.mxu0  ;;  %v403_v18 = vpop.f32.mrf.mxu1  ;;  %v441_v38 = vadd.f32 %v1062_v36, %v440_v37 }
  0xa4   : > { %640 = vrot.lane.b32.xlu2 %v525_v16, %s1181_s18  ;;  %526 = vrot.lane.b32.xlu1 %v525_v16, %s1182_s19 }
  0xa5   : > { %v444_v39 = vpack.c.bf16 %v441_v38, %v441_v38  ;;  %v984_v38 = vld [vmem:[%s1430_s5 + $0x4] sm:$0xf] }
  0xa6   : > { %v604_v30 = vsel %vm484_vm3, %v984_v38, 0 }
  0xa7   : > { %v559_v40 = vunpack.c.l.b16 %v444_v39  ;;  %v486_v44 = vsel %vm484_vm3, %v444_v39, 0 }
  0xa8   : > { %980 = vmatmul.msk.bf16.vlgmr.msra.gmra.mxu3 %vm450_vm1, %v366_v13  ;;  %495 = vmatpush.bf16.msrb.mxu0 %v486_v44 }
  0xa9   : > { %v1330_v41 = vpack.c.b16 %v559_v40, %v559_v40  ;;  %613 = vmatpush.bf16.msrb.mxu3 %v604_v30 }
  0xaa   : > { %v442_v42 = vpop.f32.mrf.mxu2 }
  0xac   : > { %733 = vrot.lane.b32.xlu2 %v525_v16, %s1183_s20  ;;  %521 = vrot.lane.b32.xlu1 %v520_v20, %s1182_s19 }
  0xad   : > { %632 = vmatpush.bf16.msra.mxu0 %v623_v45 }
  0xb4   : > { %731 = vrot.lane.b32.xlu1 %v520_v20, %s1183_s20 }
  0xbc   : > { %561 = vrot.lane.b32.xlu1 %v1330_v41, %s1182_s19 }
  0xfe   : > { %v641_v24 = vpop.permute.xlu2 %640 }
  0xff   : > { %v646_v27 = vsel %vm450_vm1, %v641_v24, 0 }
 0x106   : > { %v734_v54 = vpop.permute.xlu2 %733 }
 0x107   : > { %v739_v57 = vsel %vm450_vm1, %v734_v54, 0 }
 0x116   : > { %v527_v25 = vpop.permute.xlu1 %526 }
 0x117   : > { %v532_v26 = vsel %vm450_vm1, %v527_v25, 0 }
 0x118   : > { %541 = vmatpush.bf16.xpose.msrb.mxu1 %v532_v26 }
 0x11e   : > { %v522_v28 = vpop.permute.xlu1 %521 }
 0x11f   : > { %982 = vmatmul.msk.bf16.vlgmr.msrb.gmra.mxu1 %vm450_vm1, %v522_v28 }
 0x120   : > { %655 = vmatpush.bf16.xpose.msra.mxu1 %v646_v27 }
 0x126   : > { %v732_v58 = vpop.permute.xlu1 %731 }
 0x12b   : > { %v466_v32 = vpop.f32.mrf.mxu3 }
 0x12c   : > { %v470_v33 = vsel %vm449_vm2, %v466_v32, -1e+09 }
 0x12d   : > { %v471_v34 = vsel %vm450_vm1, %v470_v33, -inf }
 0x12e   : > { %472 = vmax.xlane.f32.xlu0 %v471_v34  ;;  %v562_v59 = vpop.permute.xlu1 %561 }
 0x12f   : > { %v567_v60 = vsel %vm484_vm3, %v562_v59, 0 }
 0x130   : > { %576 = vmatpush.bf16.msrb.mxu2 %v567_v60 }
 0x133   : > { %v468_v35 = vpop.f32.mrf.mxu3 }
 0x19c   : > { %v543_v46 = vpop.f32.mrf.mxu1 }
 0x19d   : > { %v547_v47 = vsel %vm449_vm2, %v543_v46, -1e+09 }
 0x19e   : > { %v548_v48 = vsel %vm450_vm1, %v547_v47, -inf }
 0x19f   : > { %549 = vmax.xlane.f32.xlu2 %v548_v48 }
 0x1a1   : > { %v473_v49 = vpop.xlane.xlu0 %472 }
 0x1a2   : > { %v474_v50 = vsub.f32 %v470_v33, %v473_v49 }
 0x1a4   : > { %v475_v51 = vmul.f32 1.442695, %v474_v50  ;;  %v545_v52 = vpop.f32.mrf.mxu1 }
 0x1a6   : > { %1064 = vpow2.f32 %v475_v51 }
 0x1ac   : > { %v1065_v53 = vpop.eup %1064 }
 0x1ad   : > { %v477_v55 = vsel %vm450_vm1, %v1065_v53, 0.0  ;;  %v480_v56 = vpack.c.bf16 %v1065_v53, %v1065_v53 }
 0x1ae   : > { %478 = vadd.xlane.f32.xlu0 %v477_v55 }
 0x1af   : > { %981 = vmatmul.msk.bf16.vlgmr.msrb.gmra.mxu0 %vm450_vm1, %v480_v56 }
 0x1b0   : > { %748 = vmatpush.bf16.xpose.msrb.mxu0 %v739_v57 }
 0x1b7   : > { %672 = vrot.lane.b32.xlu2 %v1330_v41, %s1181_s18 }
 0x1c2   : > { %638 = vrot.lane.b32.xlu0 %v520_v20, %s1181_s18  ;;  %s1126_s18 = scalar_lea.hbm %s1125_s17, 8 }
 0x1c3   : > { %p1127_p0 = scmp.ne.s32.totalorder %s1125_s17, %s1126_s18 }
 0x1c5   : > { %p1128_p1 = pnand %p1127_p0, %p1262_p5 }
 0x1c7   : > { %p1129_p2 = pneg %p1128_p1 }
 0x212   : > { %v550_v61 = vpop.xlane.xlu2 %549 }
 0x213   : > { %v551_v62 = vsub.f32 %v547_v47, %v550_v61 }
 0x215   : > { %v552_v63 = vmul.f32 1.442695, %v551_v62  ;;  %v989_v62 = vld [vmem:[%s1430_s5 + $0x8] sm:$0xf] }
 0x217   : > { %1066 = vpow2.f32 %v552_v63  ;;  %v715_v63 = vsel %vm484_vm3, %v989_v62, 0 }
 0x218   : > { %724 = vmatpush.bf16.msra.mxu3 %v715_v63 }
 0x21a   : > { %v673_v0 = vpop.permute.xlu2 %672 }
 0x21b   : > { %v678_v1 = vsel %vm484_vm3, %v673_v0, 0  ;;  %v993_v0 = vld [vmem:[%s1430_s5 + $0xc] sm:$0xf] }
 0x21c   : > { %687 = vmatpush.bf16.msra.mxu2 %v678_v1  ;;  %v808_v1 = vsel %vm484_vm3, %v993_v0, 0 }
 0x21d   : > { %v1067_v2 = vpop.eup %1066 }
 0x21e   : > { %v557_v3 = vpack.c.bf16 %v1067_v2, %v1067_v2  ;;  %v554_v34 = vsel %vm450_vm1, %v1067_v2, 0.0 }
 0x220   : > { %983 = vmatmul.msk.bf16.vlgmr.msrb.gmra.mxu2 %vm450_vm1, %v557_v3 }
 0x221   : > { %v479_v4 = vpop.xlane.xlu0 %478  ;;  %817 = vmatpush.bf16.msrb.mxu2 %v808_v1 }
 0x222   : > { %1068 = vrcp.f32 %v479_v4  ;;  %v512_v9 = vand.u32 2147483648, %v479_v4  ;;  %v510_v11 = vand.u32 2147483647, %v479_v4  ;;  %vm506_vm5 = vweird.f32 %v479_v4 }
 0x224   : > { %v513_v13 = vor.u32 1.1754944e-38, %v512_v9  ;;  %vm511_vm7 = vcmp.eq.f32.partialorder %v510_v11, 8.507059e+37 }
 0x228   : > { %v1069_v5 = vpop.eup %1068 }
 0x229   : > { %v502_v6 = vmul.f32 %v1069_v5, %v479_v4  ;;  %vm507_vm4 = vweird.f32 %v1069_v5 }
 0x22a   : > { %vm508_vm6 = vmor %vm506_vm5, %vm507_vm4 }
 0x22b   : > { %v503_v7 = vsub.f32 1.0, %v502_v6 }
 0x22c   : > { %v497_v8 = vpop.f32.mrf.mxu0 }
 0x22d   : > { %v504_v10 = vmul.f32 %v1069_v5, %v503_v7 }
 0x22f   : > { %v505_v12 = vadd.f32 %v1069_v5, %v504_v10 }
 0x231   : > { %v509_v14 = vsel %vm508_vm6, %v1069_v5, %v505_v12 }
 0x232   : > { %v514_v15 = vsel %vm511_vm7, %v513_v13, %v509_v14 }
 0x233   : > { %v515_v16 = vmul.f32 %v514_v15, %v497_v8 }
 0x234   : > { %v499_v17 = vpop.f32.mrf.mxu0  ;;  %v639_v18 = vpop.permute.xlu0 %638 }
 0x235   : > { %v516_v19 = vpack.c.bf16 %v515_v16, %v515_v16  ;;  %987 = vmatmul.msk.bf16.vlgmr.msra.gmra.mxu1 %vm450_vm1, %v639_v18 }
 0x237   : > { %986 = vmatmul.msk.bf16.vlgmr.msra.gmra.mxu0 %vm450_vm1, %v516_v19 }
 0x247   : > { %991 = vmatmul.msk.bf16.vlgmr.msrb.gmra.mxu0 %vm450_vm1, %v732_v58 }
 0x2a3   : > { %v578_v20 = vpop.f32.mrf.mxu2 }
 0x2ab   : > { %v580_v21 = vpop.f32.mrf.mxu2 }
 0x2b2   : > { %v657_v22 = vpop.f32.mrf.mxu1 }
 0x2b3   : > { %v661_v23 = vsel %vm449_vm2, %v657_v22, -1e+09 }
 0x2b4   : > { %v1358_v24 = vpop.f32.mrf.mxu0  ;;  %v662_v25 = vsel %vm450_vm1, %v661_v23, -inf }
 0x2b5   : > { %663 = vmax.xlane.f32.xlu1 %v662_v25 }
 0x2ba   : > { %v659_v26 = vpop.f32.mrf.mxu1 }
 0x2bc   : > { %v636_v27 = vpop.f32.mrf.mxu0 }
 0x2c4   : > { %v750_v28 = vpop.f32.mrf.mxu0 }
 0x2c5   : > { %v754_v29 = vsel %vm449_vm2, %v750_v28, -1e+09 }
 0x2c6   : > { %v755_v32 = vsel %vm450_vm1, %v754_v29, -inf }
 0x2c7   : > { %756 = vmax.xlane.f32.xlu0 %v755_v32 }
 0x2cc   : > { %v752_v33 = vpop.f32.mrf.mxu0 }
 0x2ce   : > { %765 = vrot.lane.b32.xlu1 %v1330_v41, %s1183_s20  ;;  %s310_s20 = sand.u32 1, %s1168_s25  }
 0x2cf   : > { %555 = vadd.xlane.f32.xlu0 %v554_v34  ;;  %s947_s22 = sshll.u32 %s310_s20, 3  ;;  %s831_s28 = scalar_lea.sflag [#allocation4], %s310_s20 }
 0x2d0   : > { %s312_s14 = scalar_lea.vmem [#allocation5], %s947_s22  ;;  %s1130_s22 = scalar_lea.hbm %s1432_s7, 16 }
 0x2d1   : > { %s843_s15 = sshll.u32 %s312_s14, 4  ;;  %p1132_p4 = scmp.lt.s32.totalorder %s1130_s22, %s1126_s18  ;;  %s844_s15 = int_to_ptr.vmem [resolvable:$true] %s843_s15 }
 0x2d3   : > { %p1133_p7 = por %p1132_p4, %p1131_p3 }
 0x2d5   : > { %p1134_p8 = pnand %p1133_p7, %p1129_p2 }
 0x328   : > { %v664_v35 = vpop.xlane.xlu1 %663 }
 0x329   : > { %v665_v36 = vsub.f32 %v661_v23, %v664_v35 }
 0x32b   : > { %v666_v37 = vmul.f32 1.442695, %v665_v36 }
 0x32d   : > { %1070 = vpow2.f32 %v666_v37 }
 0x333   : > { %v1071_v31 = vpop.eup %1070 }
 0x334   : > { %v671_v39 = vpack.c.bf16 %v1071_v31, %v1071_v31  ;;  %v668_v40 = vsel %vm450_vm1, %v1071_v31, 0.0 }
 0x335   : > { %669 = vadd.xlane.f32.xlu2 %v668_v40 }
 0x336   : > { %988 = vmatmul.msk.bf16.vlgmr.msra.gmra.mxu2 %vm450_vm1, %v671_v39  ;;  %v1063_v39 = vld [vmem:[%s1431_s6] ss:$0 sm:$0xff] }
 0x33a   : > { %v757_v41 = vpop.xlane.xlu0 %756 }
 0x33b   : > { %v758_v42 = vsub.f32 %v754_v29, %v757_v41 }
 0x33d   : > { %v759_v43 = vmul.f32 1.442695, %v758_v42 }
 0x33f   : > { %1072 = vpow2.f32 %v759_v43 }
 0x340   : > { %v766_v44 = vpop.permute.xlu1 %765 }
 0x341   : > { %v771_v45 = vsel %vm484_vm3, %v766_v44, 0 }
 0x342   : > { %780 = vmatpush.bf16.msrb.mxu1 %v771_v45  ;;  %v556_v46 = vpop.xlane.xlu0 %555 }
 0x343   : > { %1074 = vrcp.f32 %v556_v46  ;;  %v593_v53 = vand.u32 2147483648, %v556_v46  ;;  %v591_v55 = vand.u32 2147483647, %v556_v46  ;;  %vm587_vm9 = vweird.f32 %v556_v46 }
 0x345   : > { %v1073_v47 = vpop.eup %1072  ;;  %v594_v57 = vor.u32 1.1754944e-38, %v593_v53  ;;  %vm592_vm11 = vcmp.eq.f32.partialorder %v591_v55, 8.507059e+37 }
 0x346   : > { %v764_v48 = vpack.c.bf16 %v1073_v47, %v1073_v47  ;;  %v761_v49 = vsel %vm450_vm1, %v1073_v47, 0.0 }
 0x347   : > { %762 = vadd.xlane.f32.xlu0 %v761_v49 }
 0x348   : > { %992 = vmatmul.msk.bf16.vlgmr.msrb.gmra.mxu1 %vm450_vm1, %v764_v48 }
 0x349   : > { %v1075_v50 = vpop.eup %1074 }
 0x34a   : > { %v583_v51 = vmul.f32 %v1075_v50, %v556_v46  ;;  %vm588_vm8 = vweird.f32 %v1075_v50 }
 0x34b   : > { %vm589_vm10 = vmor %vm587_vm9, %vm588_vm8 }
 0x34c   : > { %v584_v52 = vsub.f32 1.0, %v583_v51 }
 0x34e   : > { %v585_v54 = vmul.f32 %v1075_v50, %v584_v52 }
 0x350   : > { %v586_v56 = vadd.f32 %v1075_v50, %v585_v54 }
 0x352   : > { %v590_v58 = vsel %vm589_vm10, %v1075_v50, %v586_v56 }
 0x353   : > { %v595_v59 = vsel %vm592_vm11, %v594_v57, %v590_v58 }
 0x354   : > { %v596_v60 = vmul.f32 %v595_v59, %v578_v20 }
 0x356   : > { %v597_v61 = vpack.c.bf16 %v596_v60, %v596_v60 }
 0x358   : > { %985 = vmatmul.msk.bf16.vlgmr.msrb.gmra.mxu3 %vm450_vm1, %v597_v61 }
 0x3a8   : > { %v670_v2 = vpop.xlane.xlu2 %669 }
 0x3a9   : > { %1076 = vrcp.f32 %v670_v2  ;;  %v704_v6 = vand.u32 2147483648, %v670_v2  ;;  %v702_v8 = vand.u32 2147483647, %v670_v2  ;;  %vm698_vm13 = vweird.f32 %v670_v2 }
 0x3ab   : > { %v705_v10 = vor.u32 1.1754944e-38, %v704_v6  ;;  %vm703_vm15 = vcmp.eq.f32.partialorder %v702_v8, 8.507059e+37 }
 0x3af   : > { %v1077_v3 = vpop.eup %1076 }
 0x3b0   : > { %v694_v4 = vmul.f32 %v1077_v3, %v670_v2  ;;  %vm699_vm12 = vweird.f32 %v1077_v3 }
 0x3b1   : > { %vm700_vm14 = vmor %vm698_vm13, %vm699_vm12 }
 0x3b2   : > { %v695_v5 = vsub.f32 1.0, %v694_v4 }
 0x3b4   : > { %v696_v7 = vmul.f32 %v1077_v3, %v695_v5 }
 0x3b6   : > { %v697_v9 = vadd.f32 %v1077_v3, %v696_v7 }
 0x3b8   : > { %v701_v11 = vsel %vm700_vm14, %v1077_v3, %v697_v9 }
 0x3b9   : > { %v689_v12 = vpop.f32.mrf.mxu2  ;;  %v706_v13 = vsel %vm703_vm15, %v705_v10, %v701_v11 }
 0x3ba   : > { %v707_v14 = vmul.f32 %v706_v13, %v689_v12  ;;  %v763_v15 = vpop.xlane.xlu0 %762 }
 0x3bb   : > { %1078 = vrcp.f32 %v763_v15  ;;  %v797_v21 = vand.u32 2147483648, %v763_v15  ;;  %v795_v25 = vand.u32 2147483647, %v763_v15  ;;  %vm791_vm3 = vweird.f32 %v763_v15 }
 0x3bc   : > { %v708_v16 = vpack.c.bf16 %v707_v14, %v707_v14 }
 0x3bd   : > { %v798_v27 = vor.u32 1.1754944e-38, %v797_v21  ;;  %vm796_vm5 = vcmp.eq.f32.partialorder %v795_v25, 8.507059e+37 }
 0x3be   : > { %990 = vmatmul.msk.bf16.vlgmr.msra.gmra.mxu3 %vm450_vm1, %v708_v16 }
 0x3c1   : > { %v1079_v17 = vpop.eup %1078  ;;  %v691_v18 = vpop.f32.mrf.mxu2 }
 0x3c2   : > { %v787_v19 = vmul.f32 %v1079_v17, %v763_v15  ;;  %vm792_vm2 = vweird.f32 %v1079_v17 }
 0x3c3   : > { %vm793_vm4 = vmor %vm791_vm3, %vm792_vm2 }
 0x3c4   : > { %v788_v20 = vsub.f32 1.0, %v787_v19 }
 0x3c5   : > { %v782_v22 = vpop.f32.mrf.mxu1 }
 0x3c6   : > { %v789_v23 = vmul.f32 %v1079_v17, %v788_v20 }
 0x3c8   : > { %v790_v26 = vadd.f32 %v1079_v17, %v789_v23 }
 0x3ca   : > { %v794_v28 = vsel %vm793_vm4, %v1079_v17, %v790_v26 }
 0x3cb   : > { %v799_v29 = vsel %vm796_vm5, %v798_v27, %v794_v28 }
 0x3cc   : > { %v800_v32 = vmul.f32 %v799_v29, %v782_v22 }
 0x3cd   : > { %v784_v33 = vpop.f32.mrf.mxu1 }
 0x3ce   : > { %v801_v34 = vpack.c.bf16 %v800_v32, %v800_v32 }
 0x3d0   : > { %994 = vmatmul.msk.bf16.vlgmr.msrb.gmra.mxu2 %vm450_vm1, %v801_v34 }
 0x3db   : > { %v615_v35 = vpop.f32.mrf.mxu3 }
 0x3dc   : > { %v635_v30 = vadd.f32 %v1358_v24, %v615_v35 }
 0x3e3   : > { %v617_v36 = vpop.f32.mrf.mxu3 }
 0x441   : > { %v726_v37 = vpop.f32.mrf.mxu3 }
 0x442   : > { %v730_v31 = vadd.f32 %v726_v37, %v635_v30 }
 0x449   : > { %v728_v38 = vpop.f32.mrf.mxu3 }
 0x453   : > { %v819_v40 = vpop.f32.mrf.mxu2 }
 0x454   : > { %v823_v41 = vadd.f32 %v819_v40, %v730_v31 }
 0x456   : > { %v828_v42 = vadd.f32 %v1063_v39, %v823_v41 }
 0x458   : > { %829 = vst.msk [vmem:[%s312_s14] sm:$0xff] %vm349_vm0, %v828_v42 }
 0x459   : > { %1137 = shalt.err (!%p1134_p8)
}
 0x45a   : > { %1009 = dma.vmem_to_hbm [thread:$0]  (%p1262_p5), %s844_s15, 128, %s846_s16, %s831_s28  }
 0x45b   : > { %v821_v24 = vpop.f32.mrf.mxu2 }
 0x45c PF: > { %p1021_p9 = scmp.ge.s32.totalorder %s1176_s27, 2  ;;  %s857_s20 = sand.u32 1, %s1164_s24  }
 0x45d   : > { %s858_s8 = scalar_lea.sflag [#allocation4], %s857_s20 }
 0x45e   : > { %p1016_p10 = pnand %p1021_p9, %p1266_p6 }
 0x460   : > { %p1017_p11 = pneg %p1016_p10 }
 0x462   : > { %1159 = dma.done.wait (%p1017_p11), %s858_s8, 128  }
 0x463   : > { %1161 = vsyncadd (%p1017_p11), %s858_s8, 4294967168  ;;  %p18_p12 = scmp.ge.s32.totalorder %s1249_s30, 4   ;;  %s1435_s24 = smov %s1168_s25 }
 0x464   : > { %s1436_s25 = smov %s1172_s26  ;;  %s1437_s26 = smov %s1260_s10 }
 0x465   : > { %s1438_s27 = smov %s1249_s30  ;;  %20 = sbr.rel (!%p18_p12) target bundleno = 4 (0x4), region = 101 }
 0x46a   :  { %864 = vsyncpa [#allocation3], 1 }
 0x46b   :  { %866 = vsyncpa [#allocation3 + $0x1], 1 }
 0x46c   :  { %867 = vsyncpa [#allocation4], 1 }
 0x46d   :  { %869 = vsyncpa [#allocation4 + $0x1], 1 }

</bundles_post_ra>
